<compile_context>
chip_gen: v5e
topology: v5e:2x2
jax: 0.10.0
libtpu: 0.0.40
codegen_flags: <defaults>
</compile_context>

<pallas_src>
import functools

import jax
import jax.numpy as jnp
import numpy as np
from jax.experimental import pallas as pl
from jax.experimental.pallas import tpu as pltpu


# ----------------------------------------------------------------------------
# Kernel 1: per-class histogram of valid labels (lane-dense).
# Output: per-batch counts (B, C, 1).  The tiny O(C) weight transform
# (1/log(1.02 + p)) is done in the wrapper.
# ----------------------------------------------------------------------------
def _hist_kernel(label_ref, counts_ref, counts_sc, *, class_num, hw, needs_mask):
    j = pl.program_id(1)

    @pl.when(j == 0)
    def _():
        counts_sc[...] = jnp.zeros_like(counts_sc)

    lbl = label_ref[...]                                       # (1, tile) int32
    tile = lbl.shape[1]
    if needs_mask:
        # Partial last block: out-of-range lanes get label -1 (matches nothing).
        pix = j * tile + jax.lax.broadcasted_iota(jnp.int32, (1, tile), 1)
        lbl = jnp.where(pix < hw, lbl, -1)

    classes = jax.lax.broadcasted_iota(jnp.int32, (class_num, tile), 0)
    # (lbl == c) is only true for 0 <= lbl < class_num, which is exactly the
    # "valid" mask of get_inverse_weight (255 / negative labels match nothing).
    counts_sc[...] += (lbl == classes).astype(jnp.float32)     # VALU add only

    @pl.when(j == pl.num_programs(1) - 1)
    def _():
        counts_ref[...] = jnp.sum(counts_sc[...], axis=1, keepdims=True)  # (C,1)


# ----------------------------------------------------------------------------
# Kernel 2: weighted softmax cross-entropy, class axis on sublanes.
# Outputs per-batch partial numerator / denominator (final division in wrapper).
# ----------------------------------------------------------------------------
def _weighted_ce_kernel(logit_ref, label_ref, weight_ref, num_ref, den_ref,
                        num_sc, den_sc, *, class_num, ignore_index, hw,
                        needs_mask):
    j = pl.program_id(1)

    @pl.when(j == 0)
    def _():
        num_sc[...] = jnp.zeros_like(num_sc)
        den_sc[...] = jnp.zeros_like(den_sc)

    x = logit_ref[...].astype(jnp.float32)                     # (C, tile)
    lbl = label_ref[...]                                       # (1, tile) int32
    tile = x.shape[1]

    valid = (lbl >= 0) & (lbl < class_num) & (lbl != ignore_index)   # (1, tile)
    if needs_mask:
        pix = j * tile + jax.lax.broadcasted_iota(jnp.int32, (1, tile), 1)
        pix_ok = pix < hw
        valid = valid & pix_ok
        # Sanitize out-of-range logits so exp/log stay finite (then zeroed by
        # the valid mask below).
        x = jnp.where(pix_ok, x, 0.0)

    classes = jax.lax.broadcasted_iota(jnp.int32, (class_num, tile), 0)
    onehot = (lbl == classes).astype(jnp.float32)              # (C, tile)

    # numerically stable logsumexp over the class (sublane) axis
    m = jnp.max(x, axis=0, keepdims=True)                      # (1, tile)
    lse = m + jnp.log(jnp.sum(jnp.exp(x - m), axis=0, keepdims=True))

    picked = jnp.sum(x * onehot, axis=0, keepdims=True)                # (1, tile)
    w_i = jnp.sum(weight_ref[...] * onehot, axis=0, keepdims=True)     # (1, tile)

    v = valid.astype(jnp.float32)                              # (1, tile)
    num_sc[...] += v * w_i * (lse - picked)
    den_sc[...] += v * w_i

    @pl.when(j == pl.num_programs(1) - 1)
    def _():
        num_ref[...] = jnp.sum(num_sc[...], axis=1, keepdims=True)     # (1, 1)
        den_ref[...] = jnp.sum(den_sc[...], axis=1, keepdims=True)     # (1, 1)


# ----------------------------------------------------------------------------
# Tile selection over the pixel (lane) axis.
# Returns (tile, needs_mask).  needs_mask=True means the last block is partial
# and the kernels mask out-of-range lanes with a pixel-index iota.
# ----------------------------------------------------------------------------
def _choose_tile(hw, class_num, max_tile=32768):
    # Cap the lane tile so a (C, tile) f32 logits block stays <= ~2 MiB even
    # for large class counts (double-buffered blocks + scratch must fit scoped
    # VMEM on every generation, incl. v7x's 64 MiB physical / 32 MiB scoped).
    byte_cap = max(128, (2 * 1024 * 1024) // (4 * max(class_num, 1)))
    max_tile = max(128, min(max_tile, (byte_cap // 128) * 128))

    if hw <= max_tile:
        return hw, False          # one full-width block ((8,128) rule: full dim)
    if hw % 128 == 0:
        # largest multiple-of-128 divisor of hw that fits the cap -> no mask
        for mult in range(max_tile // 128, 0, -1):
            t = mult * 128
            if hw % t == 0:
                return t, False
    # otherwise use a cdiv grid and mask the tail in-kernel (no HBM pad copy)
    return max_tile, True


# ----------------------------------------------------------------------------
# Wrapper
# ----------------------------------------------------------------------------
def inverse_weight_cross_entropy_loss(logit_nchw, label_bhw, *,
                                      class_num, ignore_index=255):
    B, C, H, W = logit_nchw.shape
    assert C == class_num
    HW = H * W

    tile, needs_mask = _choose_tile(HW, class_num)
    grid = (B, pl.cdiv(HW, tile))

    # Free reshapes (no transpose): the class axis stays contiguous and is
    # mapped onto sublanes inside the kernels; pixels are lane-dense.
    logits = logit_nchw.reshape(B, C, HW)
    labels = label_bhw.reshape(B, 1, HW).astype(jnp.int32)

    cparams = pltpu.CompilerParams(
        dimension_semantics=("parallel", "arbitrary"),
        vmem_limit_bytes=32 * 1024 * 1024,
    )

    # --- kernel 1: lane-dense label histogram (per batch) ---
    counts_b = pl.pallas_call(
        functools.partial(_hist_kernel, class_num=class_num, hw=HW,
                          needs_mask=needs_mask),
        out_shape=jax.ShapeDtypeStruct((B, class_num, 1), jnp.float32),
        grid_spec=pltpu.PrefetchScalarGridSpec(
            num_scalar_prefetch=0,
            grid=grid,
            in_specs=[pl.BlockSpec((None, 1, tile), lambda b, j: (b, 0, j))],
            out_specs=pl.BlockSpec((None, class_num, 1), lambda b, j: (b, 0, 0)),
            scratch_shapes=[pltpu.VMEM((class_num, tile), jnp.float32)],
        ),
        compiler_params=cparams,
    )(labels)

    # Tiny O(C) transform in plain JAX (counts kept in f32; exact below 2^24
    # pixels per class, which matches the float arithmetic of the reference).
    counts = jnp.sum(counts_b.reshape(B, class_num), axis=0)            # (C,)
    total = jnp.sum(counts)
    weight = (1.0 / jnp.log(1.02 + counts / total)).reshape(class_num, 1)
    weight = weight.astype(jnp.float32)

    # --- kernel 2: weighted cross entropy, class axis on sublanes ---
    num_b, den_b = pl.pallas_call(
        functools.partial(_weighted_ce_kernel,
                          class_num=class_num, ignore_index=ignore_index,
                          hw=HW, needs_mask=needs_mask),
        out_shape=(jax.ShapeDtypeStruct((B, 1, 1), jnp.float32),
                   jax.ShapeDtypeStruct((B, 1, 1), jnp.float32)),
        grid_spec=pltpu.PrefetchScalarGridSpec(
            num_scalar_prefetch=0,
            grid=grid,
            in_specs=[
                pl.BlockSpec((None, class_num, tile),
                             lambda b, j: (b, 0, j)),                   # logits
                pl.BlockSpec((None, 1, tile),
                             lambda b, j: (b, 0, j)),                   # labels
                pl.BlockSpec((class_num, 1), lambda b, j: (0, 0)),      # weights
            ],
            out_specs=(
                pl.BlockSpec((None, 1, 1), lambda b, j: (b, 0, 0)),
                pl.BlockSpec((None, 1, 1), lambda b, j: (b, 0, 0)),
            ),
            scratch_shapes=[pltpu.VMEM((1, tile), jnp.float32),
                            pltpu.VMEM((1, tile), jnp.float32)],
        ),
        compiler_params=cparams,
    )(logits, labels, weight)

    # NaN if every pixel is ignored (den == 0) -- same as the PyTorch module.
    return jnp.sum(num_b) / jnp.sum(den_b)


# ----------------------------------------------------------------------------
# Pure-JAX reference (mirrors the PyTorch module)
# ----------------------------------------------------------------------------
def _reference_loss(logit_nchw, label_bhw, class_num, ignore_index=255):
    C = class_num
    x = jnp.transpose(logit_nchw, (0, 2, 3, 1)).reshape(-1, C).astype(jnp.float32)
    y = label_bhw.reshape(-1).astype(jnp.int32)

    valid = (y >= 0) & (y < C)
    y_safe = jnp.where(valid, y, 0)
    counts = jnp.sum(jax.nn.one_hot(y_safe, C) * valid[:, None].astype(jnp.float32),
                     axis=0)
    total = jnp.sum(valid.astype(jnp.float32))
    w = 1.0 / jnp.log(1.02 + counts / total)

    lse = jax.scipy.special.logsumexp(x, axis=-1)
    picked = jnp.take_along_axis(x, y_safe[:, None], axis=-1)[:, 0]
    ce_valid = valid & (y != ignore_index)
    wy = w[y_safe]
    num = jnp.sum(jnp.where(ce_valid, wy * (lse - picked), 0.0))
    den = jnp.sum(jnp.where(ce_valid, wy, 0.0))
    return num / den


if __name__ == "__main__":
    class_num = 8
    B, H, W = 2, 16, 16
    key = jax.random.PRNGKey(0)
    k1, k2, k3 = jax.random.split(key, 3)

    logit = jax.random.normal(k1, (B, class_num, H, W), dtype=jnp.float32)
    label = jax.random.randint(k2, (B, H, W), 0, class_num, dtype=jnp.int32)
    # sprinkle some ignore_index pixels
    ignore_mask = jax.random.uniform(k3, (B, H, W)) < 0.1
    label = jnp.where(ignore_mask, 255, label)

    loss = inverse_weight_cross_entropy_loss(
        logit, label, class_num=class_num, ignore_index=255)
    loss = jax.block_until_ready(loss)

    ref = _reference_loss(logit, label, class_num, ignore_index=255)
    np.testing.assert_allclose(np.asarray(loss), np.asarray(ref),
                               rtol=1e-5, atol=1e-5)
    print("KERNEL_OK")
</pallas_src>

<mosaic_0001>
module attributes {stable_mosaic.version = 11 : i64} {
  func.func @_hist_kernel(%arg0: i32, %arg1: i32, %arg2: memref<1x1x256xi32, #tpu.memory_space<vmem>>, %arg3: memref<1x8x1xf32, #tpu.memory_space<vmem>>, %arg4: memref<8x256xf32, #tpu.memory_space<vmem>>) attributes {dimension_semantics = [#tpu.dimension_semantics<parallel>, #tpu.dimension_semantics<arbitrary>], iteration_bounds = array<i64: 2, 1>, scalar_prefetch = 0 : i64, scratch_operands = 1 : i64, tpu.core_type = #tpu.core_type<tc>, window_params = [{transform_indices = @transform_0, window_bounds = array<i64: 1, 1, 256>}, {transform_indices = @transform_1, window_bounds = array<i64: 1, 8, 1>}]} {
    %c0_i32 = arith.constant 0 : i32
    %0 = arith.cmpi eq, %arg1, %c0_i32 : i32
    %1 = arith.extui %0 : i1 to i32
    %c0_i32_0 = arith.constant 0 : i32
    %2 = arith.cmpi ne, %1, %c0_i32_0 : i32
    scf.if %2 {
      %cst = arith.constant 0.000000e+00 : f32
      %16 = vector.broadcast %cst : f32 to vector<8x256xf32>
      %c0_9 = arith.constant 0 : index
      %c0_10 = arith.constant 0 : index
      %17 = vector.load %arg4[%c0_9, %c0_10] : memref<8x256xf32, #tpu.memory_space<vmem>>, vector<8x256xf32>
      tpu.vector_store %arg4[%c0_9, %c0_10], %16 {strides = array<i32>} : memref<8x256xf32, #tpu.memory_space<vmem>>, vector<8x256xf32>,
    } else {
    }
    %c0 = arith.constant 0 : index
    %c0_1 = arith.constant 0 : index
    %c0_2 = arith.constant 0 : index
    %3 = vector.load %arg2[%c0, %c0_1, %c0_2] : memref<1x1x256xi32, #tpu.memory_space<vmem>>, vector<1x1x256xi32>
    %4 = vector.shape_cast %3 : vector<1x1x256xi32> to vector<1x256xi32>
    %5 = tpu.iota {dimensions = array<i32: 0>} : vector<8x256xi32>
    %c0_3 = arith.constant 0 : index
    %c0_4 = arith.constant 0 : index
    %6 = vector.load %arg4[%c0_3, %c0_4] : memref<8x256xf32, #tpu.memory_space<vmem>>, vector<8x256xf32>
    %7 = vector.broadcast %4 : vector<1x256xi32> to vector<8x256xi32>
    %8 = arith.cmpi eq, %7, %5 : vector<8x256xi32>
    %9 = arith.extui %8 : vector<8x256xi1> to vector<8x256xi32>
    %10 = arith.sitofp %9 : vector<8x256xi32> to vector<8x256xf32>
    %11 = arith.addf %6, %10 : vector<8x256xf32>
    %c0_5 = arith.constant 0 : index
    %c0_6 = arith.constant 0 : index
    %12 = vector.load %arg4[%c0_5, %c0_6] : memref<8x256xf32, #tpu.memory_space<vmem>>, vector<8x256xf32>
    tpu.vector_store %arg4[%c0_5, %c0_6], %11 {strides = array<i32>} : memref<8x256xf32, #tpu.memory_space<vmem>>, vector<8x256xf32>,
    %c0_i32_7 = arith.constant 0 : i32
    %13 = arith.cmpi eq, %arg1, %c0_i32_7 : i32
    %14 = arith.extui %13 : i1 to i32
    %c0_i32_8 = arith.constant 0 : i32
    %15 = arith.cmpi ne, %14, %c0_i32_8 : i32
    scf.if %15 {
      %c0_9 = arith.constant 0 : index
      %c0_10 = arith.constant 0 : index
      %16 = vector.load %arg4[%c0_9, %c0_10] : memref<8x256xf32, #tpu.memory_space<vmem>>, vector<8x256xf32>
      %cst = arith.constant dense<0.000000e+00> : vector<8xf32>
      %17 = vector.multi_reduction <add>, %16, %cst [1] : vector<8x256xf32> to vector<8xf32>
      %18 = vector.shape_cast %17 : vector<8xf32> to vector<8x1xf32>
      %c0_11 = arith.constant 0 : index
      %c0_12 = arith.constant 0 : index
      %c0_13 = arith.constant 0 : index
      %19 = vector.load %arg3[%c0_11, %c0_12, %c0_13] : memref<1x8x1xf32, #tpu.memory_space<vmem>>, vector<1x8x1xf32>
      %20 = vector.shape_cast %19 : vector<1x8x1xf32> to vector<8x1xf32>
      %21 = vector.shape_cast %18 : vector<8x1xf32> to vector<1x8x1xf32>
      tpu.vector_store %arg3[%c0_11, %c0_12, %c0_13], %21 {strides = array<i32>} : memref<1x8x1xf32, #tpu.memory_space<vmem>>, vector<1x8x1xf32>,
    } else {
    }
    return
  }
  func.func @transform_0(%arg0: i32, %arg1: i32) -> (i32, i32, i32) {
    %c0_i32 = arith.constant 0 : i32
    %c0_i32_0 = arith.constant 0 : i32
    return %arg0, %c0_i32, %arg1 : i32, i32, i32
  }
  func.func @transform_1(%arg0: i32, %arg1: i32) -> (i32, i32, i32) {
    %c0_i32 = arith.constant 0 : i32
    %c0_i32_0 = arith.constant 0 : i32
    %c0_i32_1 = arith.constant 0 : i32
    return %arg0, %c0_i32, %c0_i32_0 : i32, i32, i32
  }
}

</mosaic_0001>

<bundles_post_ra>
// kernel: tpu_custom_call.1
= control target key start
LH: loop header
LB: loop body
LE: loop exit
PB: predicated region body
PF: predicated region fallthrough
CT: control target
= control target key end

     0   :  { %6 = vsyncpa [#allocation4], 0  ;;  %s509_s0 = inlined_call_operand.hbm [shape: s32[2,1,256], index: 0, kind: input, shape index: {}]   ;;  %s510_s1 = inlined_call_operand.vmem [shape: f32[2,8,1], index: 1, kind: output, shape index: {}]  }
   0x1   :  { %8 = vsyncpa [#allocation4 + $0x1], 0  ;;  %s421_s6 = smov 0   ;;  %s423_s7 = smov 0  }
   0x2   :  { %s425_s8 = smov 0   ;;  %s427_s9 = smov 0  }
   0x3   :  { %s429_s10 = smov 0   ;;  %s431_s11 = smov 0  }
   0x4 LB: > { %s259_s12 = sadd.s32 4294967295, %s408_s11   ;;  %s26_s13 = sadd.s32 1, %s404_s10  ;;  %s408_s11 = sphi %s431_s11, %s14_s11   ;;  %s404_s10 = sphi %s429_s10, %s517_s10   ;;  %s400_s9 = sphi %s427_s9, %s516_s9   ;;  %s396_s8 = sphi %s425_s8, %s515_s8   ;;  %s392_s7 = sphi %s423_s7, %s514_s7   ;;  %s388_s6 = sphi %s421_s6, %s513_s6  }
   0x5   : > { %p28_p0 = scmp.ge.s32.totalorder %s26_s13, 2  ;;  %s35_s14 = sadd.s32 1, %s396_s8 }
   0x6   : > { %p42_p1 = scmp.ne.s32.totalorder %s396_s8, %s392_s7  ;;  %p43_p2 = scmp.eq.s32.totalorder %s408_s11, 0 }
   0x7   : > { %s519_s13 = smov (%p28_p0, %s26_s13), 0  ;;  %p48_p4 = scmp.ne.s32.totalorder %s392_s7, %s388_s6 }
   0x8   : > { %p457_p3 = por %p43_p2, %p42_p1  ;;  %s30_s16 = ssub.s32 %s404_s10, %s519_s13 }
   0x9   : > { %p49_p5 = scmp.eq.s32.totalorder %s259_s12, 0  ;;  %p33_p6 = scmp.eq.s32.totalorder %s30_s16, 0 }
   0xa   : > { %p278_p8 = scmp.lt.s32.totalorder %s408_s11, 2  ;;  %s98_s19 = sand.u32 1, %s396_s8  }
   0xb   : > { %p464_p7 = por %p49_p5, %p48_p4  ;;  %s264_s20 = sshll.u32 %s404_s10, 1 }
   0xc   : > { %s470_s18 = scalar_select %p33_p6, %s396_s8, %s35_s14  }
   0xd   : > { %s263_s21 = sshll.u32 %s98_s19, 1  ;;  %s108_s24 = scalar_lea.hbm %s509_s0, %s264_s20 }
   0xe   : > { %s110_s25 = sshll.u32 %s108_s24, 4  ;;  %s102_s26 = scalar_lea.vmem [#allocation3], %s263_s21  ;;  %s111_s25 = int_to_ptr.hbm [resolvable:$true] %s110_s25 }
   0xf   : > { %s112_s27 = sshll.u32 %s102_s26, 4  ;;  %p275_p9 = pnand %p278_p8, %p457_p3  ;;  %s113_s27 = int_to_ptr.vmem [resolvable:$true] %s112_s27 }
  0x10   : > { %p265_p10 = scmp.ge.s32.totalorder %s408_s11, 1  ;;  %p117_p11 = scmp.lt.s32.totalorder %s408_s11, 3 }
  0x11   : > { %s99_s28 = scalar_lea.sflag [#allocation4], %s98_s19 }
  0x12   : > { %277 = dma.hbm_to_vmem [thread:$0]  (!%p275_p9), %s111_s25, 32, %s113_s27, %s99_s28  }
  0x13   : > { %p118_p12 = pnand %p265_p10, %p117_p11 }
  0x14   : > { %s123_s29 = sand.u32 (!%p118_p12), 1, %s392_s7  }
  0x15   : > { %121 = sbr.rel (%p118_p12) target bundleno = 152 (0x98), region = 24  ;;  %s266_s30 = sshll.u32 (!%p118_p12), %s123_s29, 1 }
  0x16   : > { %s124_s2 = scalar_lea.sflag (!%p118_p12), [#allocation4], %s123_s29  ;;  %s127_s3 = scalar_lea.vmem (!%p118_p12), [#allocation3], %s266_s30 }
  0x1a   : > { %383 = dma.done.wait (%p464_p7), %s124_s2, 32  }
  0x1b   : > { %385 = vsyncadd (%p464_p7), %s124_s2, 4294967264  ;;  %v158_v0 = vlaneseq  ;;  %v157_v2 = vld [vmem:[%s127_s3] sm:$0x3]  ;;  %v410_v5 = vmov 0.0   ;;  %p147_p13 = scmp.lt.s32.totalorder %s400_s9, 1  ;;  %vm182_vm2 = vcmask 7168  }
  0x1c   : > { %v162_v3 = vperm.slane %v157_v2, 0  ;;  %v163_v4 = vperm.slane %v157_v2, 1 }
  0x1d   : > { %v159_v1 = vshrl.u32 %v158_v0, 7  ;;  %s521_s9 = smov (!%p147_p13, %s400_s9), 1 }
  0x1e   : > { %s267_s4 = sshll.u32 %s521_s9, 3 }
  0x1f   : > { %vm164_vm0 = vcmp.eq.s32.totalorder %v162_v3, %v159_v1  ;;  %vm165_vm1 = vcmp.eq.s32.totalorder %v163_v4, %v159_v1  ;;  %s150_s12 = scalar_lea.vmem %s510_s1, %s267_s4 }
  0x20   : > { %v268_v6 = vsel %vm164_vm0, 1.0, %v410_v5  ;;  %v269_v7 = vsel %vm165_vm1, 1.0, %v410_v5 }
  0x21   : > { %v179_v8 = vadd.f32 %v269_v7, %v268_v6 }
  0x23   : > { %180 = vadd.xlane.f32.xlu0 %v179_v8 }
  0x96   : > { %v181_v9 = vpop.xlane.xlu0 %180 }
  0x97   : > { %183 = vst.msk [vmem:[%s150_s12] sm:$0xff] %vm182_vm2, %v181_v9 }
  0x98 PF: > { %s14_s11 = sadd.s32 1, %s408_s11   ;;  %s513_s6 = smov %s392_s7 }
  0x99   : > { %p11_p0 = scmp.ge.s32.totalorder %s14_s11, 4   ;;  %s514_s7 = smov %s396_s8 }
  0x9a   : > { %s515_s8 = smov %s470_s18  ;;  %s516_s9 = smov %s404_s10 }
  0x9b   : > { %s517_s10 = smov %s519_s13  ;;  %13 = sbr.rel (!%p11_p0) target bundleno = 4 (0x4), region = 72 }
  0xa0   :  { %203 = vsyncpa [#allocation4], 1 }
  0xa1   :  { %205 = vsyncpa [#allocation4 + $0x1], 1 }

</bundles_post_ra>
